<compile_context>
chip_gen: v7x
topology: tpu7x:2x2x1
jax: 0.10.0
libtpu: 0.0.40
codegen_flags: <defaults>
</compile_context>

<pallas_src>
import jax
import jax.numpy as jnp
from jax.experimental import pallas as pl
from jax.experimental.pallas import tpu as pltpu

# ---- BlendParams defaults (pytorch3d.renderer.blending.BlendParams) ----
SIGMA = 1e-4
GAMMA = 1e-4
BACKGROUND = (1.0, 1.0, 1.0)
ZNEAR = 1.0
ZFAR = 100.0
EPS = 1e-10

LANE = 128


def _softmax_rgb_blend_kernel(packed_ref, out_ref):
    # packed_ref: (5K, TR, 128)  rows [0:K]=dists (pre-masked to +inf),
    #                            rows [K:2K]=zbuf (pre-masked to ZFAR),
    #                            rows [2K + 3*k + c] = color channel c of face k.
    # out_ref:    (4, TR, 128)   r, g, b, alpha.
    K = packed_ref.shape[0] // 5
    neg_inv_sigma = -1.0 / SIGMA
    inv_gamma = 1.0 / GAMMA
    inv_zrange = 1.0 / (ZFAR - ZNEAR)

    # ---- Pass 1: alpha = prod_k(1 - prob_k), z_inv_max = max_k z_inv_k ----
    prob0 = jax.nn.sigmoid(packed_ref[0] * neg_inv_sigma)            # (TR, 128)
    alpha = 1.0 - prob0
    z_inv_max = (ZFAR - packed_ref[K]) * inv_zrange
    for kk in range(1, K):
        prob_k = jax.nn.sigmoid(packed_ref[kk] * neg_inv_sigma)
        alpha = alpha * (1.0 - prob_k)
        z_inv_max = jnp.maximum(z_inv_max, (ZFAR - packed_ref[K + kk]) * inv_zrange)
    z_inv_max = jnp.maximum(z_inv_max, EPS)                           # (TR, 128)

    # ---- Pass 2: fused accumulation of denom and weighted rgb --------------
    # Recompute prob/z_inv per face (cheap, EUP/VALU have large slack); only
    # (TR,128)-sized accumulators stay live.
    delta = jnp.maximum(jnp.exp((EPS - z_inv_max) * inv_gamma), EPS)  # (TR, 128)
    denom = delta
    r = delta * BACKGROUND[0]
    g = delta * BACKGROUND[1]
    b = delta * BACKGROUND[2]
    for kk in range(K):
        prob_k = jax.nn.sigmoid(packed_ref[kk] * neg_inv_sigma)
        z_inv_k = (ZFAR - packed_ref[K + kk]) * inv_zrange
        w_k = prob_k * jnp.exp((z_inv_k - z_inv_max) * inv_gamma)     # (TR, 128)
        denom = denom + w_k
        base = 2 * K + 3 * kk
        r = r + w_k * packed_ref[base + 0]
        g = g + w_k * packed_ref[base + 1]
        b = b + w_k * packed_ref[base + 2]

    # One exact reciprocal reused for all three RGB channels (approx=True's
    # ~2^-12 relative error would violate the 1e-5 reference tolerance).
    inv_denom = pl.reciprocal(denom, approx=False)

    # Four direct, dense, lane-full slab stores (no jnp.stack temporary).
    out_ref[0] = r * inv_denom
    out_ref[1] = g * inv_denom
    out_ref[2] = b * inv_denom
    out_ref[3] = 1.0 - alpha


def softmax_rgb_blend_pallas(colors, pix_to_face, dists, zbuf, *, rows_per_block=512):
    """colors: (N,H,W,K,3) f32; pix_to_face: (N,H,W,K) int; dists/zbuf: (N,H,W,K) f32
    returns images: (N,H,W,4) f32  (same layout/semantics as pytorch3d softmax_rgb_blend)"""
    N, H, W, K, C = colors.shape
    assert C == 3
    P = N * H * W

    # Rows of 128 pixels; block = (tr rows) x 128 lanes, tr a multiple of 8.
    R = pl.cdiv(P, LANE)
    R8 = pl.cdiv(R, 8) * 8
    tr = min(rows_per_block, R8)
    if R8 > 8:
        # Ensure at least 2 grid blocks so both v7x TensorCores get work.
        tr = min(tr, pl.cdiv(pl.cdiv(R8, 2), 8) * 8)
    num_blocks = pl.cdiv(R8, tr)
    R_pad = num_blocks * tr
    P_pad = R_pad * LANE
    pad = P_pad - P

    # ---- Single fused wrapper pass to the kernel-native layout ------------
    # Pre-mask with pix_to_face (sentinels keep results bit-equivalent to the
    # masked formulation: sigmoid(-inf)=0 exactly, (ZFAR-ZFAR)/range=0 exactly),
    # stack everything into one (P, 5K) array, one 2-D transpose, one pad.
    bg = pix_to_face.reshape(P, K) < 0
    d = jnp.where(bg, jnp.inf, dists.reshape(P, K).astype(jnp.float32))       # (P, K)
    z = jnp.where(bg, ZFAR, zbuf.reshape(P, K).astype(jnp.float32))           # (P, K)
    col = colors.reshape(P, K * 3).astype(jnp.float32)                        # (P, 3K)
    packed = jnp.concatenate([d, z, col], axis=-1).T                          # (5K, P)
    if pad:
        packed = jnp.pad(packed, ((0, 0), (0, pad)))                          # tail is benign
    packed = packed.reshape(5 * K, R_pad, LANE)

    out = pl.pallas_call(
        _softmax_rgb_blend_kernel,
        out_shape=jax.ShapeDtypeStruct((4, R_pad, LANE), jnp.float32),
        grid_spec=pltpu.PrefetchScalarGridSpec(
            num_scalar_prefetch=0,
            grid=(num_blocks,),
            in_specs=[
                pl.BlockSpec((5 * K, tr, LANE), lambda i: (0, i, 0)),
            ],
            out_specs=pl.BlockSpec((4, tr, LANE), lambda i: (0, i, 0)),
        ),
        compiler_params=pltpu.CompilerParams(
            dimension_semantics=("parallel",),
            vmem_limit_bytes=48 * 1024 * 1024,
        ),
    )(packed)

    # TODO(synk): if the consumer accepts channel-first output, return
    # out.reshape(4, P_pad)[:, :P].reshape(4, N, H, W) and skip this transpose.
    out = out.reshape(4, P_pad)[:, :P]
    return out.T.reshape(N, H, W, 4)


class ColorShader:
    """JAX/Pallas version of the PyTorch ColorShader: colors = texels,
    images = softmax_rgb_blend(colors, fragments, blend_params)."""

    def __call__(self, texels, pix_to_face, dists, zbuf):
        return softmax_rgb_blend_pallas(texels, pix_to_face, dists, zbuf)


def _reference_blend(colors, pix_to_face, dists, zbuf):
    """Plain-JAX mirror of pytorch3d.softmax_rgb_blend for verification."""
    mask = (pix_to_face >= 0).astype(jnp.float32)                      # (N,H,W,K)
    prob = jax.nn.sigmoid(-dists / SIGMA) * mask
    alpha = jnp.prod(1.0 - prob, axis=-1)
    z_inv = (ZFAR - zbuf) / (ZFAR - ZNEAR) * mask
    z_inv_max = jnp.maximum(jnp.max(z_inv, axis=-1, keepdims=True), EPS)
    weights_num = prob * jnp.exp((z_inv - z_inv_max) / GAMMA)
    delta = jnp.maximum(jnp.exp((EPS - z_inv_max) / GAMMA), EPS)
    denom = jnp.sum(weights_num, axis=-1, keepdims=True) + delta
    bg = jnp.array(BACKGROUND, dtype=jnp.float32)
    weighted_colors = jnp.sum(weights_num[..., None] * colors, axis=-2)
    rgb = (weighted_colors + delta * bg) / denom
    return jnp.concatenate([rgb, (1.0 - alpha)[..., None]], axis=-1)


if __name__ == "__main__":
    N, H, W, K = 2, 16, 16, 4

    key = jax.random.PRNGKey(0)
    k1, k2, k3, k4 = jax.random.split(key, 4)

    # Synthetic "fragments" + sampled texels.
    colors = jax.random.uniform(k1, (N, H, W, K, 3), dtype=jnp.float32)
    dists = jax.random.uniform(k2, (N, H, W, K), dtype=jnp.float32) * 1e-3
    zbuf = ZNEAR + jax.random.uniform(k3, (N, H, W, K), dtype=jnp.float32) * (ZFAR - ZNEAR) * 0.5
    # pix_to_face: -1 means "no face covers this pixel" (background).
    pix_to_face = jax.random.randint(k4, (N, H, W, K), minval=-1, maxval=100, dtype=jnp.int32)

    shader = ColorShader()
    images = shader(colors, pix_to_face, dists, zbuf)
    images = jax.block_until_ready(images)

    ref = _reference_blend(colors, pix_to_face, dists, zbuf)
    assert images.shape == (N, H, W, 4)
    assert jnp.allclose(images, ref, atol=1e-5, rtol=1e-5), "mismatch vs reference"

    print("KERNEL_OK")
</pallas_src>

<mosaic_0001>
module attributes {stable_mosaic.version = 11 : i64} {
  func.func @_softmax_rgb_blend_kernel(%arg0: i32, %arg1: memref<20x8x128xf32, #tpu.memory_space<vmem>>, %arg2: memref<4x8x128xf32, #tpu.memory_space<vmem>>) attributes {dimension_semantics = [#tpu.dimension_semantics<parallel>], iteration_bounds = array<i64: 1>, scalar_prefetch = 0 : i64, scratch_operands = 0 : i64, tpu.core_type = #tpu.core_type<tc>, window_params = [{transform_indices = @transform_0, window_bounds = array<i64: 20, 8, 128>}, {transform_indices = @transform_1, window_bounds = array<i64: 4, 8, 128>}]} {
    %c0 = arith.constant 0 : index
    %c0_0 = arith.constant 0 : index
    %c0_1 = arith.constant 0 : index
    %0 = vector.load %arg1[%c0, %c0_0, %c0_1] : memref<20x8x128xf32, #tpu.memory_space<vmem>>, vector<1x8x128xf32>
    %1 = vector.shape_cast %0 : vector<1x8x128xf32> to vector<8x128xf32>
    %cst = arith.constant -1.000000e+04 : f32
    %2 = vector.broadcast %cst : f32 to vector<8x128xf32>
    %3 = arith.mulf %1, %2 : vector<8x128xf32>
    %4 = arith.negf %3 : vector<8x128xf32>
    %5 = math.exp %4 : vector<8x128xf32>
    %cst_2 = arith.constant 1.000000e+00 : f32
    %6 = vector.broadcast %cst_2 : f32 to vector<8x128xf32>
    %7 = arith.addf %6, %5 : vector<8x128xf32>
    %8 = arith.divf %6, %7 : vector<8x128xf32>
    %cst_3 = arith.constant 1.000000e+00 : f32
    %9 = vector.broadcast %cst_3 : f32 to vector<8x128xf32>
    %10 = arith.subf %9, %8 : vector<8x128xf32>
    %c4 = arith.constant 4 : index
    %c0_4 = arith.constant 0 : index
    %c0_5 = arith.constant 0 : index
    %11 = vector.load %arg1[%c4, %c0_4, %c0_5] : memref<20x8x128xf32, #tpu.memory_space<vmem>>, vector<1x8x128xf32>
    %12 = vector.shape_cast %11 : vector<1x8x128xf32> to vector<8x128xf32>
    %cst_6 = arith.constant 1.000000e+02 : f32
    %13 = vector.broadcast %cst_6 : f32 to vector<8x128xf32>
    %14 = arith.subf %13, %12 : vector<8x128xf32>
    %cst_7 = arith.constant 0.0101010101 : f32
    %15 = vector.broadcast %cst_7 : f32 to vector<8x128xf32>
    %16 = arith.mulf %14, %15 : vector<8x128xf32>
    %c1 = arith.constant 1 : index
    %c0_8 = arith.constant 0 : index
    %c0_9 = arith.constant 0 : index
    %17 = vector.load %arg1[%c1, %c0_8, %c0_9] : memref<20x8x128xf32, #tpu.memory_space<vmem>>, vector<1x8x128xf32>
    %18 = vector.shape_cast %17 : vector<1x8x128xf32> to vector<8x128xf32>
    %cst_10 = arith.constant -1.000000e+04 : f32
    %19 = vector.broadcast %cst_10 : f32 to vector<8x128xf32>
    %20 = arith.mulf %18, %19 : vector<8x128xf32>
    %21 = arith.negf %20 : vector<8x128xf32>
    %22 = math.exp %21 : vector<8x128xf32>
    %cst_11 = arith.constant 1.000000e+00 : f32
    %23 = vector.broadcast %cst_11 : f32 to vector<8x128xf32>
    %24 = arith.addf %23, %22 : vector<8x128xf32>
    %25 = arith.divf %23, %24 : vector<8x128xf32>
    %cst_12 = arith.constant 1.000000e+00 : f32
    %26 = vector.broadcast %cst_12 : f32 to vector<8x128xf32>
    %27 = arith.subf %26, %25 : vector<8x128xf32>
    %28 = arith.mulf %10, %27 : vector<8x128xf32>
    %c5 = arith.constant 5 : index
    %c0_13 = arith.constant 0 : index
    %c0_14 = arith.constant 0 : index
    %29 = vector.load %arg1[%c5, %c0_13, %c0_14] : memref<20x8x128xf32, #tpu.memory_space<vmem>>, vector<1x8x128xf32>
    %30 = vector.shape_cast %29 : vector<1x8x128xf32> to vector<8x128xf32>
    %cst_15 = arith.constant 1.000000e+02 : f32
    %31 = vector.broadcast %cst_15 : f32 to vector<8x128xf32>
    %32 = arith.subf %31, %30 : vector<8x128xf32>
    %cst_16 = arith.constant 0.0101010101 : f32
    %33 = vector.broadcast %cst_16 : f32 to vector<8x128xf32>
    %34 = arith.mulf %32, %33 : vector<8x128xf32>
    %35 = arith.maximumf %16, %34 : vector<8x128xf32>
    %c2 = arith.constant 2 : index
    %c0_17 = arith.constant 0 : index
    %c0_18 = arith.constant 0 : index
    %36 = vector.load %arg1[%c2, %c0_17, %c0_18] : memref<20x8x128xf32, #tpu.memory_space<vmem>>, vector<1x8x128xf32>
    %37 = vector.shape_cast %36 : vector<1x8x128xf32> to vector<8x128xf32>
    %cst_19 = arith.constant -1.000000e+04 : f32
    %38 = vector.broadcast %cst_19 : f32 to vector<8x128xf32>
    %39 = arith.mulf %37, %38 : vector<8x128xf32>
    %40 = arith.negf %39 : vector<8x128xf32>
    %41 = math.exp %40 : vector<8x128xf32>
    %cst_20 = arith.constant 1.000000e+00 : f32
    %42 = vector.broadcast %cst_20 : f32 to vector<8x128xf32>
    %43 = arith.addf %42, %41 : vector<8x128xf32>
    %44 = arith.divf %42, %43 : vector<8x128xf32>
    %cst_21 = arith.constant 1.000000e+00 : f32
    %45 = vector.broadcast %cst_21 : f32 to vector<8x128xf32>
    %46 = arith.subf %45, %44 : vector<8x128xf32>
    %47 = arith.mulf %28, %46 : vector<8x128xf32>
    %c6 = arith.constant 6 : index
    %c0_22 = arith.constant 0 : index
    %c0_23 = arith.constant 0 : index
    %48 = vector.load %arg1[%c6, %c0_22, %c0_23] : memref<20x8x128xf32, #tpu.memory_space<vmem>>, vector<1x8x128xf32>
    %49 = vector.shape_cast %48 : vector<1x8x128xf32> to vector<8x128xf32>
    %cst_24 = arith.constant 1.000000e+02 : f32
    %50 = vector.broadcast %cst_24 : f32 to vector<8x128xf32>
    %51 = arith.subf %50, %49 : vector<8x128xf32>
    %cst_25 = arith.constant 0.0101010101 : f32
    %52 = vector.broadcast %cst_25 : f32 to vector<8x128xf32>
    %53 = arith.mulf %51, %52 : vector<8x128xf32>
    %54 = arith.maximumf %35, %53 : vector<8x128xf32>
    %c3 = arith.constant 3 : index
    %c0_26 = arith.constant 0 : index
    %c0_27 = arith.constant 0 : index
    %55 = vector.load %arg1[%c3, %c0_26, %c0_27] : memref<20x8x128xf32, #tpu.memory_space<vmem>>, vector<1x8x128xf32>
    %56 = vector.shape_cast %55 : vector<1x8x128xf32> to vector<8x128xf32>
    %cst_28 = arith.constant -1.000000e+04 : f32
    %57 = vector.broadcast %cst_28 : f32 to vector<8x128xf32>
    %58 = arith.mulf %56, %57 : vector<8x128xf32>
    %59 = arith.negf %58 : vector<8x128xf32>
    %60 = math.exp %59 : vector<8x128xf32>
    %cst_29 = arith.constant 1.000000e+00 : f32
    %61 = vector.broadcast %cst_29 : f32 to vector<8x128xf32>
    %62 = arith.addf %61, %60 : vector<8x128xf32>
    %63 = arith.divf %61, %62 : vector<8x128xf32>
    %cst_30 = arith.constant 1.000000e+00 : f32
    %64 = vector.broadcast %cst_30 : f32 to vector<8x128xf32>
    %65 = arith.subf %64, %63 : vector<8x128xf32>
    %66 = arith.mulf %47, %65 : vector<8x128xf32>
    %c7 = arith.constant 7 : index
    %c0_31 = arith.constant 0 : index
    %c0_32 = arith.constant 0 : index
    %67 = vector.load %arg1[%c7, %c0_31, %c0_32] : memref<20x8x128xf32, #tpu.memory_space<vmem>>, vector<1x8x128xf32>
    %68 = vector.shape_cast %67 : vector<1x8x128xf32> to vector<8x128xf32>
    %cst_33 = arith.constant 1.000000e+02 : f32
    %69 = vector.broadcast %cst_33 : f32 to vector<8x128xf32>
    %70 = arith.subf %69, %68 : vector<8x128xf32>
    %cst_34 = arith.constant 0.0101010101 : f32
    %71 = vector.broadcast %cst_34 : f32 to vector<8x128xf32>
    %72 = arith.mulf %70, %71 : vector<8x128xf32>
    %73 = arith.maximumf %54, %72 : vector<8x128xf32>
    %cst_35 = arith.constant 1.000000e-10 : f32
    %74 = vector.broadcast %cst_35 : f32 to vector<8x128xf32>
    %75 = arith.maximumf %73, %74 : vector<8x128xf32>
    %cst_36 = arith.constant 1.000000e-10 : f32
    %76 = vector.broadcast %cst_36 : f32 to vector<8x128xf32>
    %77 = arith.subf %76, %75 : vector<8x128xf32>
    %cst_37 = arith.constant 1.000000e+04 : f32
    %78 = vector.broadcast %cst_37 : f32 to vector<8x128xf32>
    %79 = arith.mulf %77, %78 : vector<8x128xf32>
    %80 = math.exp %79 : vector<8x128xf32>
    %cst_38 = arith.constant 1.000000e-10 : f32
    %81 = vector.broadcast %cst_38 : f32 to vector<8x128xf32>
    %82 = arith.maximumf %80, %81 : vector<8x128xf32>
    %cst_39 = arith.constant 1.000000e+00 : f32
    %83 = vector.broadcast %cst_39 : f32 to vector<8x128xf32>
    %84 = arith.mulf %82, %83 : vector<8x128xf32>
    %cst_40 = arith.constant 1.000000e+00 : f32
    %85 = vector.broadcast %cst_40 : f32 to vector<8x128xf32>
    %86 = arith.mulf %82, %85 : vector<8x128xf32>
    %cst_41 = arith.constant 1.000000e+00 : f32
    %87 = vector.broadcast %cst_41 : f32 to vector<8x128xf32>
    %88 = arith.mulf %82, %87 : vector<8x128xf32>
    %c0_42 = arith.constant 0 : index
    %c0_43 = arith.constant 0 : index
    %c0_44 = arith.constant 0 : index
    %89 = vector.load %arg1[%c0_42, %c0_43, %c0_44] : memref<20x8x128xf32, #tpu.memory_space<vmem>>, vector<1x8x128xf32>
    %90 = vector.shape_cast %89 : vector<1x8x128xf32> to vector<8x128xf32>
    %cst_45 = arith.constant -1.000000e+04 : f32
    %91 = vector.broadcast %cst_45 : f32 to vector<8x128xf32>
    %92 = arith.mulf %90, %91 : vector<8x128xf32>
    %93 = arith.negf %92 : vector<8x128xf32>
    %94 = math.exp %93 : vector<8x128xf32>
    %cst_46 = arith.constant 1.000000e+00 : f32
    %95 = vector.broadcast %cst_46 : f32 to vector<8x128xf32>
    %96 = arith.addf %95, %94 : vector<8x128xf32>
    %97 = arith.divf %95, %96 : vector<8x128xf32>
    %c4_47 = arith.constant 4 : index
    %c0_48 = arith.constant 0 : index
    %c0_49 = arith.constant 0 : index
    %98 = vector.load %arg1[%c4_47, %c0_48, %c0_49] : memref<20x8x128xf32, #tpu.memory_space<vmem>>, vector<1x8x128xf32>
    %99 = vector.shape_cast %98 : vector<1x8x128xf32> to vector<8x128xf32>
    %cst_50 = arith.constant 1.000000e+02 : f32
    %100 = vector.broadcast %cst_50 : f32 to vector<8x128xf32>
    %101 = arith.subf %100, %99 : vector<8x128xf32>
    %cst_51 = arith.constant 0.0101010101 : f32
    %102 = vector.broadcast %cst_51 : f32 to vector<8x128xf32>
    %103 = arith.mulf %101, %102 : vector<8x128xf32>
    %104 = arith.subf %103, %75 : vector<8x128xf32>
    %cst_52 = arith.constant 1.000000e+04 : f32
    %105 = vector.broadcast %cst_52 : f32 to vector<8x128xf32>
    %106 = arith.mulf %104, %105 : vector<8x128xf32>
    %107 = math.exp %106 : vector<8x128xf32>
    %108 = arith.mulf %97, %107 : vector<8x128xf32>
    %109 = arith.addf %82, %108 : vector<8x128xf32>
    %c8 = arith.constant 8 : index
    %c0_53 = arith.constant 0 : index
    %c0_54 = arith.constant 0 : index
    %110 = vector.load %arg1[%c8, %c0_53, %c0_54] : memref<20x8x128xf32, #tpu.memory_space<vmem>>, vector<1x8x128xf32>
    %111 = vector.shape_cast %110 : vector<1x8x128xf32> to vector<8x128xf32>
    %112 = arith.mulf %108, %111 : vector<8x128xf32>
    %113 = arith.addf %84, %112 : vector<8x128xf32>
    %c9 = arith.constant 9 : index
    %c0_55 = arith.constant 0 : index
    %c0_56 = arith.constant 0 : index
    %114 = vector.load %arg1[%c9, %c0_55, %c0_56] : memref<20x8x128xf32, #tpu.memory_space<vmem>>, vector<1x8x128xf32>
    %115 = vector.shape_cast %114 : vector<1x8x128xf32> to vector<8x128xf32>
    %116 = arith.mulf %108, %115 : vector<8x128xf32>
    %117 = arith.addf %86, %116 : vector<8x128xf32>
    %c10 = arith.constant 10 : index
    %c0_57 = arith.constant 0 : index
    %c0_58 = arith.constant 0 : index
    %118 = vector.load %arg1[%c10, %c0_57, %c0_58] : memref<20x8x128xf32, #tpu.memory_space<vmem>>, vector<1x8x128xf32>
    %119 = vector.shape_cast %118 : vector<1x8x128xf32> to vector<8x128xf32>
    %120 = arith.mulf %108, %119 : vector<8x128xf32>
    %121 = arith.addf %88, %120 : vector<8x128xf32>
    %c1_59 = arith.constant 1 : index
    %c0_60 = arith.constant 0 : index
    %c0_61 = arith.constant 0 : index
    %122 = vector.load %arg1[%c1_59, %c0_60, %c0_61] : memref<20x8x128xf32, #tpu.memory_space<vmem>>, vector<1x8x128xf32>
    %123 = vector.shape_cast %122 : vector<1x8x128xf32> to vector<8x128xf32>
    %cst_62 = arith.constant -1.000000e+04 : f32
    %124 = vector.broadcast %cst_62 : f32 to vector<8x128xf32>
    %125 = arith.mulf %123, %124 : vector<8x128xf32>
    %126 = arith.negf %125 : vector<8x128xf32>
    %127 = math.exp %126 : vector<8x128xf32>
    %cst_63 = arith.constant 1.000000e+00 : f32
    %128 = vector.broadcast %cst_63 : f32 to vector<8x128xf32>
    %129 = arith.addf %128, %127 : vector<8x128xf32>
    %130 = arith.divf %128, %129 : vector<8x128xf32>
    %c5_64 = arith.constant 5 : index
    %c0_65 = arith.constant 0 : index
    %c0_66 = arith.constant 0 : index
    %131 = vector.load %arg1[%c5_64, %c0_65, %c0_66] : memref<20x8x128xf32, #tpu.memory_space<vmem>>, vector<1x8x128xf32>
    %132 = vector.shape_cast %131 : vector<1x8x128xf32> to vector<8x128xf32>
    %cst_67 = arith.constant 1.000000e+02 : f32
    %133 = vector.broadcast %cst_67 : f32 to vector<8x128xf32>
    %134 = arith.subf %133, %132 : vector<8x128xf32>
    %cst_68 = arith.constant 0.0101010101 : f32
    %135 = vector.broadcast %cst_68 : f32 to vector<8x128xf32>
    %136 = arith.mulf %134, %135 : vector<8x128xf32>
    %137 = arith.subf %136, %75 : vector<8x128xf32>
    %cst_69 = arith.constant 1.000000e+04 : f32
    %138 = vector.broadcast %cst_69 : f32 to vector<8x128xf32>
    %139 = arith.mulf %137, %138 : vector<8x128xf32>
    %140 = math.exp %139 : vector<8x128xf32>
    %141 = arith.mulf %130, %140 : vector<8x128xf32>
    %142 = arith.addf %109, %141 : vector<8x128xf32>
    %c11 = arith.constant 11 : index
    %c0_70 = arith.constant 0 : index
    %c0_71 = arith.constant 0 : index
    %143 = vector.load %arg1[%c11, %c0_70, %c0_71] : memref<20x8x128xf32, #tpu.memory_space<vmem>>, vector<1x8x128xf32>
    %144 = vector.shape_cast %143 : vector<1x8x128xf32> to vector<8x128xf32>
    %145 = arith.mulf %141, %144 : vector<8x128xf32>
    %146 = arith.addf %113, %145 : vector<8x128xf32>
    %c12 = arith.constant 12 : index
    %c0_72 = arith.constant 0 : index
    %c0_73 = arith.constant 0 : index
    %147 = vector.load %arg1[%c12, %c0_72, %c0_73] : memref<20x8x128xf32, #tpu.memory_space<vmem>>, vector<1x8x128xf32>
    %148 = vector.shape_cast %147 : vector<1x8x128xf32> to vector<8x128xf32>
    %149 = arith.mulf %141, %148 : vector<8x128xf32>
    %150 = arith.addf %117, %149 : vector<8x128xf32>
    %c13 = arith.constant 13 : index
    %c0_74 = arith.constant 0 : index
    %c0_75 = arith.constant 0 : index
    %151 = vector.load %arg1[%c13, %c0_74, %c0_75] : memref<20x8x128xf32, #tpu.memory_space<vmem>>, vector<1x8x128xf32>
    %152 = vector.shape_cast %151 : vector<1x8x128xf32> to vector<8x128xf32>
    %153 = arith.mulf %141, %152 : vector<8x128xf32>
    %154 = arith.addf %121, %153 : vector<8x128xf32>
    %c2_76 = arith.constant 2 : index
    %c0_77 = arith.constant 0 : index
    %c0_78 = arith.constant 0 : index
    %155 = vector.load %arg1[%c2_76, %c0_77, %c0_78] : memref<20x8x128xf32, #tpu.memory_space<vmem>>, vector<1x8x128xf32>
    %156 = vector.shape_cast %155 : vector<1x8x128xf32> to vector<8x128xf32>
    %cst_79 = arith.constant -1.000000e+04 : f32
    %157 = vector.broadcast %cst_79 : f32 to vector<8x128xf32>
    %158 = arith.mulf %156, %157 : vector<8x128xf32>
    %159 = arith.negf %158 : vector<8x128xf32>
    %160 = math.exp %159 : vector<8x128xf32>
    %cst_80 = arith.constant 1.000000e+00 : f32
    %161 = vector.broadcast %cst_80 : f32 to vector<8x128xf32>
    %162 = arith.addf %161, %160 : vector<8x128xf32>
    %163 = arith.divf %161, %162 : vector<8x128xf32>
    %c6_81 = arith.constant 6 : index
    %c0_82 = arith.constant 0 : index
    %c0_83 = arith.constant 0 : index
    %164 = vector.load %arg1[%c6_81, %c0_82, %c0_83] : memref<20x8x128xf32, #tpu.memory_space<vmem>>, vector<1x8x128xf32>
    %165 = vector.shape_cast %164 : vector<1x8x128xf32> to vector<8x128xf32>
    %cst_84 = arith.constant 1.000000e+02 : f32
    %166 = vector.broadcast %cst_84 : f32 to vector<8x128xf32>
    %167 = arith.subf %166, %165 : vector<8x128xf32>
    %cst_85 = arith.constant 0.0101010101 : f32
    %168 = vector.broadcast %cst_85 : f32 to vector<8x128xf32>
    %169 = arith.mulf %167, %168 : vector<8x128xf32>
    %170 = arith.subf %169, %75 : vector<8x128xf32>
    %cst_86 = arith.constant 1.000000e+04 : f32
    %171 = vector.broadcast %cst_86 : f32 to vector<8x128xf32>
    %172 = arith.mulf %170, %171 : vector<8x128xf32>
    %173 = math.exp %172 : vector<8x128xf32>
    %174 = arith.mulf %163, %173 : vector<8x128xf32>
    %175 = arith.addf %142, %174 : vector<8x128xf32>
    %c14 = arith.constant 14 : index
    %c0_87 = arith.constant 0 : index
    %c0_88 = arith.constant 0 : index
    %176 = vector.load %arg1[%c14, %c0_87, %c0_88] : memref<20x8x128xf32, #tpu.memory_space<vmem>>, vector<1x8x128xf32>
    %177 = vector.shape_cast %176 : vector<1x8x128xf32> to vector<8x128xf32>
    %178 = arith.mulf %174, %177 : vector<8x128xf32>
    %179 = arith.addf %146, %178 : vector<8x128xf32>
    %c15 = arith.constant 15 : index
    %c0_89 = arith.constant 0 : index
    %c0_90 = arith.constant 0 : index
    %180 = vector.load %arg1[%c15, %c0_89, %c0_90] : memref<20x8x128xf32, #tpu.memory_space<vmem>>, vector<1x8x128xf32>
    %181 = vector.shape_cast %180 : vector<1x8x128xf32> to vector<8x128xf32>
    %182 = arith.mulf %174, %181 : vector<8x128xf32>
    %183 = arith.addf %150, %182 : vector<8x128xf32>
    %c16 = arith.constant 16 : index
    %c0_91 = arith.constant 0 : index
    %c0_92 = arith.constant 0 : index
    %184 = vector.load %arg1[%c16, %c0_91, %c0_92] : memref<20x8x128xf32, #tpu.memory_space<vmem>>, vector<1x8x128xf32>
    %185 = vector.shape_cast %184 : vector<1x8x128xf32> to vector<8x128xf32>
    %186 = arith.mulf %174, %185 : vector<8x128xf32>
    %187 = arith.addf %154, %186 : vector<8x128xf32>
    %c3_93 = arith.constant 3 : index
    %c0_94 = arith.constant 0 : index
    %c0_95 = arith.constant 0 : index
    %188 = vector.load %arg1[%c3_93, %c0_94, %c0_95] : memref<20x8x128xf32, #tpu.memory_space<vmem>>, vector<1x8x128xf32>
    %189 = vector.shape_cast %188 : vector<1x8x128xf32> to vector<8x128xf32>
    %cst_96 = arith.constant -1.000000e+04 : f32
    %190 = vector.broadcast %cst_96 : f32 to vector<8x128xf32>
    %191 = arith.mulf %189, %190 : vector<8x128xf32>
    %192 = arith.negf %191 : vector<8x128xf32>
    %193 = math.exp %192 : vector<8x128xf32>
    %cst_97 = arith.constant 1.000000e+00 : f32
    %194 = vector.broadcast %cst_97 : f32 to vector<8x128xf32>
    %195 = arith.addf %194, %193 : vector<8x128xf32>
    %196 = arith.divf %194, %195 : vector<8x128xf32>
    %c7_98 = arith.constant 7 : index
    %c0_99 = arith.constant 0 : index
    %c0_100 = arith.constant 0 : index
    %197 = vector.load %arg1[%c7_98, %c0_99, %c0_100] : memref<20x8x128xf32, #tpu.memory_space<vmem>>, vector<1x8x128xf32>
    %198 = vector.shape_cast %197 : vector<1x8x128xf32> to vector<8x128xf32>
    %cst_101 = arith.constant 1.000000e+02 : f32
    %199 = vector.broadcast %cst_101 : f32 to vector<8x128xf32>
    %200 = arith.subf %199, %198 : vector<8x128xf32>
    %cst_102 = arith.constant 0.0101010101 : f32
    %201 = vector.broadcast %cst_102 : f32 to vector<8x128xf32>
    %202 = arith.mulf %200, %201 : vector<8x128xf32>
    %203 = arith.subf %202, %75 : vector<8x128xf32>
    %cst_103 = arith.constant 1.000000e+04 : f32
    %204 = vector.broadcast %cst_103 : f32 to vector<8x128xf32>
    %205 = arith.mulf %203, %204 : vector<8x128xf32>
    %206 = math.exp %205 : vector<8x128xf32>
    %207 = arith.mulf %196, %206 : vector<8x128xf32>
    %208 = arith.addf %175, %207 : vector<8x128xf32>
    %c17 = arith.constant 17 : index
    %c0_104 = arith.constant 0 : index
    %c0_105 = arith.constant 0 : index
    %209 = vector.load %arg1[%c17, %c0_104, %c0_105] : memref<20x8x128xf32, #tpu.memory_space<vmem>>, vector<1x8x128xf32>
    %210 = vector.shape_cast %209 : vector<1x8x128xf32> to vector<8x128xf32>
    %211 = arith.mulf %207, %210 : vector<8x128xf32>
    %212 = arith.addf %179, %211 : vector<8x128xf32>
    %c18 = arith.constant 18 : index
    %c0_106 = arith.constant 0 : index
    %c0_107 = arith.constant 0 : index
    %213 = vector.load %arg1[%c18, %c0_106, %c0_107] : memref<20x8x128xf32, #tpu.memory_space<vmem>>, vector<1x8x128xf32>
    %214 = vector.shape_cast %213 : vector<1x8x128xf32> to vector<8x128xf32>
    %215 = arith.mulf %207, %214 : vector<8x128xf32>
    %216 = arith.addf %183, %215 : vector<8x128xf32>
    %c19 = arith.constant 19 : index
    %c0_108 = arith.constant 0 : index
    %c0_109 = arith.constant 0 : index
    %217 = vector.load %arg1[%c19, %c0_108, %c0_109] : memref<20x8x128xf32, #tpu.memory_space<vmem>>, vector<1x8x128xf32>
    %218 = vector.shape_cast %217 : vector<1x8x128xf32> to vector<8x128xf32>
    %219 = arith.mulf %207, %218 : vector<8x128xf32>
    %220 = arith.addf %187, %219 : vector<8x128xf32>
    %221 = tpu.reciprocal %208 : vector<8x128xf32> -> vector<8x128xf32>
    %222 = arith.mulf %212, %221 : vector<8x128xf32>
    %c0_110 = arith.constant 0 : index
    %c0_111 = arith.constant 0 : index
    %c0_112 = arith.constant 0 : index
    %223 = vector.load %arg2[%c0_110, %c0_111, %c0_112] : memref<4x8x128xf32, #tpu.memory_space<vmem>>, vector<1x8x128xf32>
    %224 = vector.shape_cast %223 : vector<1x8x128xf32> to vector<8x128xf32>
    %225 = vector.shape_cast %222 : vector<8x128xf32> to vector<1x8x128xf32>
    tpu.vector_store %arg2[%c0_110, %c0_111, %c0_112], %225 {strides = array<i32>} : memref<4x8x128xf32, #tpu.memory_space<vmem>>, vector<1x8x128xf32>,
    %226 = arith.mulf %216, %221 : vector<8x128xf32>
    %c1_113 = arith.constant 1 : index
    %c0_114 = arith.constant 0 : index
    %c0_115 = arith.constant 0 : index
    %227 = vector.load %arg2[%c1_113, %c0_114, %c0_115] : memref<4x8x128xf32, #tpu.memory_space<vmem>>, vector<1x8x128xf32>
    %228 = vector.shape_cast %227 : vector<1x8x128xf32> to vector<8x128xf32>
    %229 = vector.shape_cast %226 : vector<8x128xf32> to vector<1x8x128xf32>
    tpu.vector_store %arg2[%c1_113, %c0_114, %c0_115], %229 {strides = array<i32>} : memref<4x8x128xf32, #tpu.memory_space<vmem>>, vector<1x8x128xf32>,
    %230 = arith.mulf %220, %221 : vector<8x128xf32>
    %c2_116 = arith.constant 2 : index
    %c0_117 = arith.constant 0 : index
    %c0_118 = arith.constant 0 : index
    %231 = vector.load %arg2[%c2_116, %c0_117, %c0_118] : memref<4x8x128xf32, #tpu.memory_space<vmem>>, vector<1x8x128xf32>
    %232 = vector.shape_cast %231 : vector<1x8x128xf32> to vector<8x128xf32>
    %233 = vector.shape_cast %230 : vector<8x128xf32> to vector<1x8x128xf32>
    tpu.vector_store %arg2[%c2_116, %c0_117, %c0_118], %233 {strides = array<i32>} : memref<4x8x128xf32, #tpu.memory_space<vmem>>, vector<1x8x128xf32>,
    %cst_119 = arith.constant 1.000000e+00 : f32
    %234 = vector.broadcast %cst_119 : f32 to vector<8x128xf32>
    %235 = arith.subf %234, %66 : vector<8x128xf32>
    %c3_120 = arith.constant 3 : index
    %c0_121 = arith.constant 0 : index
    %c0_122 = arith.constant 0 : index
    %236 = vector.load %arg2[%c3_120, %c0_121, %c0_122] : memref<4x8x128xf32, #tpu.memory_space<vmem>>, vector<1x8x128xf32>
    %237 = vector.shape_cast %236 : vector<1x8x128xf32> to vector<8x128xf32>
    %238 = vector.shape_cast %235 : vector<8x128xf32> to vector<1x8x128xf32>
    tpu.vector_store %arg2[%c3_120, %c0_121, %c0_122], %238 {strides = array<i32>} : memref<4x8x128xf32, #tpu.memory_space<vmem>>, vector<1x8x128xf32>,
    return
  }
  func.func @transform_0(%arg0: i32) -> (i32, i32, i32) {
    %c0_i32 = arith.constant 0 : i32
    %c0_i32_0 = arith.constant 0 : i32
    %c0_i32_1 = arith.constant 0 : i32
    return %c0_i32, %arg0, %c0_i32_0 : i32, i32, i32
  }
  func.func @transform_1(%arg0: i32) -> (i32, i32, i32) {
    %c0_i32 = arith.constant 0 : i32
    %c0_i32_0 = arith.constant 0 : i32
    %c0_i32_1 = arith.constant 0 : i32
    return %c0_i32, %arg0, %c0_i32_0 : i32, i32, i32
  }
}

</mosaic_0001>

<bundles_post_ra>
// kernel: tpu_custom_call.1
= control target key start
LH: loop header
LB: loop body
LE: loop exit
PB: predicated region body
PF: predicated region fallthrough
CT: control target
= control target key end

     0   :  { %6 = vsyncpa [#allocation3], 0  ;;  %s319_s0 = inlined_call_operand.hbm [shape: f32[20,8,128], index: 0, kind: input, shape index: {}]   ;;  %s320_s1 = inlined_call_operand.hbm [shape: f32[4,8,128], index: 1, kind: output, shape index: {}]  }
   0x1   :  { %7 = vsyncpa [#allocation4], 0  ;;  %s275_s6 = smov [#allocation2]   ;;  %s227_s10 = scalar_lea.hbm %s319_s0, 2560 }
   0x2   :  { %s13_s7 = sshll.u32 %s275_s6, 4  ;;  %p228_p0 = scmp.ne.s32.totalorder %s319_s0, %s227_s10  ;;  %s14_s7 = int_to_ptr.vmem [resolvable:$true] %s13_s7 }
   0x3   :  { %p231_p1 = scmp.lt.u32.totalorder %s227_s10, %s319_s0 }
   0x5   :  { %p233_p2 = pnand %p231_p1, %p228_p0 }
   0x7   :  { %236 = shalt.err (!%p233_p2)
}
   0x8   :  { %s237_s15 = scalar_lea.vmem %s14_s7, 2560  ;;  %p242_p4 = scmp.lt.s32.totalorder %s14_s7, %s14_s7 }
   0x9   :  { %p238_p3 = scmp.ne.s32.totalorder %s14_s7, %s237_s15  ;;  %p243_p5 = scmp.lt.s32.totalorder %s237_s15, %s237_s15 }
   0xb   :  { %p244_p6 = por %p243_p5, %p242_p4 }
   0xd   :  { %p245_p7 = pnand %p244_p6, %p238_p3 }
   0xf   :  { %248 = shalt.err (!%p245_p7)
}
  0x10   :  { %s276_s16 = smov 128   ;;  %s277_s17 = smov 8  }
  0x11   :  { %19 = dma.hbm_to_vmem [thread:$0]  %s319_s0, 2560, %s14_s7, [#allocation3], %s276_s16, %s276_s16, %s277_s17  }
  0x12   :  { %271 = dma.done.wait [#allocation3], 2560  }
  0x13   :  { %272 = vsyncadd [#allocation3], 4294964736  ;;  %v23_v0 = vld [vmem:[#allocation2] sm:$0xff]  ;;  %v37_v2 = vld [vmem:[#allocation2 + $0x8] sm:$0xff]  ;;  %s278_s0 = smov [#allocation5]  }
  0x14   :  { %v33_v1 = vld [vmem:[#allocation2 + $0x20] sm:$0xff]  ;;  %v191_v3 = vmul.f32 10000.0, %v23_v0  ;;  %v192_v5 = vmul.f32 10000.0, %v37_v2  ;;  %v48_v6 = vld [vmem:[#allocation2 + $0x28] sm:$0xff]  ;;  %v53_v7 = vld [vmem:[#allocation2 + $0x10] sm:$0xff]  ;;  %s179_s20 = sshll.u32 %s278_s0, 4  ;;  %s180_s20 = int_to_ptr.vmem [resolvable:$true] %s179_s20 }
  0x15   :  { %v34_v4 = vsub.f32 100.0, %v33_v1  ;;  %v64_v8 = vld [vmem:[#allocation2 + $0x30] sm:$0xff]  ;;  %v49_v9 = vsub.f32 100.0, %v48_v6  ;;  %v193_v10 = vmul.f32 10000.0, %v53_v7  ;;  %v69_v12 = vld [vmem:[#allocation2 + $0x18] sm:$0xff]  ;;  %v97_v60 = vld [vmem:[#allocation2 + $0x40] sm:$0xff]  ;;  %p254_p9 = scmp.lt.s32.totalorder %s180_s20, %s180_s20 }
  0x16   :  { %v65_v11 = vsub.f32 100.0, %v64_v8  ;;  %v80_v13 = vld [vmem:[#allocation2 + $0x38] sm:$0xff]  ;;  %v26_v14 = vmul.f32 1.442695, %v191_v3  ;;  %v40_v16 = vmul.f32 1.442695, %v192_v5 }
  0x17   :  { %v35_v15 = vmul.f32 0.01010101, %v34_v4  ;;  %v50_v17 = vmul.f32 0.01010101, %v49_v9  ;;  %v56_v18 = vmul.f32 1.442695, %v193_v10 }
  0x18   :  { %v66_v19 = vmul.f32 0.01010101, %v65_v11  ;;  %199 = vpow2.f32 %v26_v14  ;;  %v194_v20 = vmul.f32 10000.0, %v69_v12  ;;  %v81_v21 = vsub.f32 100.0, %v80_v13  ;;  %v101_v61 = vld [vmem:[#allocation2 + $0x48] sm:$0xff]  ;;  %v105_v2 = vld [vmem:[#allocation2 + $0x50] sm:$0xff] }
  0x19   :  { %201 = vpow2.f32 %v40_v16  ;;  %v51_v22 = vmax.f32 %v35_v15, %v50_v17  ;;  %v115_v5 = vld [vmem:[#allocation2 + $0x58] sm:$0xff]  ;;  %v119_v11 = vld [vmem:[#allocation2 + $0x60] sm:$0xff]  ;;  %v123_v13 = vld [vmem:[#allocation2 + $0x68] sm:$0xff]  ;;  %s249_s21 = scalar_lea.vmem %s180_s20, 512 }
  0x1a   :  { %203 = vpow2.f32 %v56_v18  ;;  %v72_v23 = vmul.f32 1.442695, %v194_v20  ;;  %v82_v24 = vmul.f32 0.01010101, %v81_v21  ;;  %v133_v20 = vld [vmem:[#allocation2 + $0x70] sm:$0xff]  ;;  %p250_p8 = scmp.ne.s32.totalorder %s180_s20, %s249_s21  ;;  %p255_p10 = scmp.lt.s32.totalorder %s249_s21, %s249_s21 }
  0x1b   :  { %v67_v25 = vmax.f32 %v51_v22, %v66_v19 }
  0x1c   :  { %205 = vpow2.f32 %v72_v23  ;;  %v137_v23 = vld [vmem:[#allocation2 + $0x78] sm:$0xff]  ;;  %p256_p11 = por %p255_p10, %p254_p9 }
  0x1d   :  { %v83_v26 = vmax.f32 %v67_v25, %v82_v24 }
  0x1e   :  { %p257_p12 = pnand %p256_p11, %p250_p8 }
  0x1f   :  { %v84_v27 = vmax.f32 %v83_v26, 1e-10 }
  0x21   :  { %v85_v28 = vsub.f32 1e-10, %v84_v27  ;;  %v90_v29 = vsub.f32 %v35_v15, %v84_v27  ;;  %v108_v30 = vsub.f32 %v50_v17, %v84_v27  ;;  %v126_v31 = vsub.f32 %v66_v19, %v84_v27 }
  0x22   :  { %v200_v32 = vpop.eup %199  ;;  %v144_v33 = vsub.f32 %v82_v24, %v84_v27  ;;  %v141_v27 = vld [vmem:[#allocation2 + $0x80] sm:$0xff] }
  0x23   :  { %v202_v34 = vpop.eup %201  ;;  %v28_v35 = vadd.f32 1.0, %v200_v32  ;;  %v86_v36 = vmul.f32 10000.0, %v85_v28  ;;  %v91_v37 = vmul.f32 10000.0, %v90_v29  ;;  %v109_v38 = vmul.f32 10000.0, %v108_v30 }
  0x24   :  { %v204_v39 = vpop.eup %203  ;;  %v42_v40 = vadd.f32 1.0, %v202_v34  ;;  %v127_v41 = vmul.f32 10000.0, %v126_v31  ;;  %v145_v44 = vmul.f32 10000.0, %v144_v33  ;;  %v151_v33 = vld [vmem:[#allocation2 + $0x88] sm:$0xff] }
  0x25   :  { %207 = vrcp.f32 %v28_v35  ;;  %v58_v42 = vadd.f32 1.0, %v204_v39  ;;  %v87_v43 = vmul.f32 1.442695, %v86_v36  ;;  %v92_v46 = vmul.f32 1.442695, %v91_v37  ;;  %v155_v35 = vld [vmem:[#allocation2 + $0x90] sm:$0xff] }
  0x26   :  { %v206_v45 = vpop.eup %205  ;;  %209 = vrcp.f32 %v42_v40  ;;  %v110_v48 = vmul.f32 1.442695, %v109_v38  ;;  %v128_v49 = vmul.f32 1.442695, %v127_v41  ;;  %v146_v50 = vmul.f32 1.442695, %v145_v44 }
  0x27   :  { %211 = vrcp.f32 %v58_v42  ;;  %v74_v47 = vadd.f32 1.0, %v206_v45  ;;  %v159_v39 = vld [vmem:[#allocation2 + $0x98] sm:$0xff] }
  0x28   :  { %213 = vpow2.f32 %v87_v43 }
  0x29   :  { %215 = vrcp.f32 %v74_v47 }
  0x2a   :  { %217 = vpow2.f32 %v92_v46 }
  0x2b   :  { %219 = vpow2.f32 %v110_v48 }
  0x2c   :  { %221 = vpow2.f32 %v128_v49 }
  0x2d   :  { %223 = vpow2.f32 %v146_v50 }
  0x2f   :  { %v208_v51 = vpop.eup %207 }
  0x30   :  { %v210_v52 = vpop.eup %209  ;;  %v31_v53 = vsub.f32 1.0, %v208_v51 }
  0x31   :  { %v212_v54 = vpop.eup %211  ;;  %v45_v55 = vsub.f32 1.0, %v210_v52 }
  0x32   :  { %v214_v56 = vpop.eup %213  ;;  %v61_v63 = vsub.f32 1.0, %v212_v54 }
  0x33   :  { %v216_v57 = vpop.eup %215  ;;  %v89_v58 = vmax.f32 %v214_v56, 1e-10  ;;  %v46_v62 = vmul.f32 %v45_v55, %v31_v53 }
  0x34   :  { %v218_v59 = vpop.eup %217  ;;  %v77_v15 = vsub.f32 1.0, %v216_v57 }
  0x35   :  { %v220_v0 = vpop.eup %219  ;;  %v94_v1 = vmul.f32 %v218_v59, %v208_v51  ;;  %v62_v14 = vmul.f32 %v61_v63, %v46_v62 }
  0x36   :  { %v222_v3 = vpop.eup %221  ;;  %v112_v4 = vmul.f32 %v220_v0, %v210_v52 }
  0x37   :  { %v224_v6 = vpop.eup %223  ;;  %v95_v7 = vadd.f32 %v94_v1, %v89_v58  ;;  %v98_v8 = vmul.f32 %v97_v60, %v94_v1  ;;  %v130_v9 = vmul.f32 %v222_v3, %v212_v54  ;;  %v102_v10 = vmul.f32 %v101_v61, %v94_v1 }
  0x38   :  { %v106_v12 = vmul.f32 %v105_v2, %v94_v1  ;;  %v116_v18 = vmul.f32 %v115_v5, %v112_v4  ;;  %v148_v19 = vmul.f32 %v224_v6, %v216_v57  ;;  %v120_v22 = vmul.f32 %v119_v11, %v112_v4 }
  0x39   :  { %v99_v16 = vadd.f32 %v98_v8, %v89_v58  ;;  %v113_v17 = vadd.f32 %v112_v4, %v95_v7  ;;  %v103_v21 = vadd.f32 %v102_v10, %v89_v58  ;;  %v124_v26 = vmul.f32 %v123_v13, %v112_v4 }
  0x3a   :  { %v107_v24 = vadd.f32 %v106_v12, %v89_v58  ;;  %v78_v28 = vmul.f32 %v77_v15, %v62_v14  ;;  %v134_v30 = vmul.f32 %v133_v20, %v130_v9  ;;  %v138_v32 = vmul.f32 %v137_v23, %v130_v9 }
  0x3b   :  { %v131_v25 = vadd.f32 %v130_v9, %v113_v17  ;;  %v117_v29 = vadd.f32 %v116_v18, %v99_v16  ;;  %v121_v34 = vadd.f32 %v120_v22, %v103_v21  ;;  %v142_v37 = vmul.f32 %v141_v27, %v130_v9 }
  0x3c   :  { %v125_v36 = vadd.f32 %v124_v26, %v107_v24  ;;  %v171_v38 = vsub.f32 1.0, %v78_v28  ;;  %v152_v40 = vmul.f32 %v151_v33, %v148_v19  ;;  %v156_v41 = vmul.f32 %v155_v35, %v148_v19 }
  0x3d   :  { %v149_v31 = vadd.f32 %v148_v19, %v131_v25  ;;  %v135_v42 = vadd.f32 %v134_v30, %v117_v29  ;;  %v139_v43 = vadd.f32 %v138_v32, %v121_v34  ;;  %v160_v45 = vmul.f32 %v159_v39, %v148_v19 }
  0x3e   :  { %173 = vst [vmem:[#allocation5 + $0x18] sm:$0xff] %v171_v38  ;;  %v143_v44 = vadd.f32 %v142_v37, %v125_v36 }
  0x3f   :  { %225 = vrcp.f32 %v149_v31  ;;  %v153_v46 = vadd.f32 %v152_v40, %v135_v42  ;;  %v157_v47 = vadd.f32 %v156_v41, %v139_v43 }
  0x40   :  { %v161_v48 = vadd.f32 %v160_v45, %v143_v44 }
  0x49   :  { %v226_v49 = vpop.eup %225 }
  0x4a   :  { %v163_v50 = vmul.f32 %v226_v49, %v153_v46  ;;  %v165_v51 = vmul.f32 %v226_v49, %v157_v47  ;;  %v168_v52 = vmul.f32 %v226_v49, %v161_v48 }
  0x4c   :  { %164 = vst [vmem:[#allocation5] sm:$0xff] %v163_v50  ;;  %167 = vst [vmem:[#allocation5 + $0x8] sm:$0xff] %v165_v51 }
  0x4d   :  { %170 = vst [vmem:[#allocation5 + $0x10] sm:$0xff] %v168_v52 }
  0x4e   :  { %260 = shalt.err (!%p257_p12)
}
  0x4f   :  { %s261_s24 = scalar_lea.hbm %s320_s1, 512 }
  0x50   :  { %p262_p13 = scmp.ne.s32.totalorder %s320_s1, %s261_s24  ;;  %p265_p0 = scmp.lt.u32.totalorder %s261_s24, %s320_s1 }
  0x52   :  { %p267_p1 = pnand %p265_p0, %p262_p13 }
  0x54   :  { %270 = shalt.err (!%p267_p1)
}
  0x55   :  { %185 = dma.vmem_to_hbm [thread:$0]  %s180_s20, 512, %s320_s1, [#allocation4], %s276_s16, %s276_s16, %s277_s17  }
  0x56   :  { %273 = dma.done.wait [#allocation4], 512  }
  0x57   :  { %274 = vsyncadd [#allocation4], 4294966784 }
  0x58   :  { %189 = vsyncpa [#allocation3], 1 }
  0x59   :  { %190 = vsyncpa [#allocation4], 1 }

</bundles_post_ra>
